<compile_context>
chip_gen: v7x
topology: tpu7x:2x2x1
jax: 0.10.0
libtpu: 0.0.40
codegen_flags: <defaults>
</compile_context>

<pallas_src>
import functools
import math

import jax
import jax.numpy as jnp
from jax.experimental import pallas as pl
from jax.experimental.pallas import tpu as pltpu


def _round_up(v, m):
    return ((v + m - 1) // m) * m


def _choose_tile(dim, max_tile, base):
    """Pick a tile (multiple of `base`, <= max_tile) for a dim padded to `base`.

    Prefers a tile that evenly divides the aligned dim (avoids a jnp.pad pass
    over the operand); falls back to the clamped max tile (with padding) if no
    divisor >= max_tile // 2 exists.
    """
    aligned = _round_up(max(int(dim), 1), base)
    t = max(base, (min(max_tile, aligned) // base) * base)
    cand = t
    while cand >= max(base, t // 2):
        if aligned % cand == 0:
            return cand
        cand -= base
    return t


def _vmem_limit_bytes(need):
    """Generation-aware VMEM budget: scaled from the tile footprint, capped
    below the physical capacity of the current TPU (64 MiB on v7x)."""
    try:
        cap = int(pltpu.get_tpu_info().vmem_capacity_bytes)
    except Exception:
        cap = 64 << 20  # conservative: v7x per-TensorCore VMEM
    limit = int(min(max(4 * need, 32 << 20), 0.7 * cap))
    return max(limit, int(need) + (4 << 20))


# ------------------------- tiled matmul kernels ------------------------- #
# f32 output path: accumulate directly into the resident output block
# (output BlockSpec is constant across the k axis), no scratch / no copy.

def _mm_acc_out_kernel(a_ref, b_ref, o_ref):
    @pl.when(pl.program_id(2) == 0)
    def _():
        o_ref[...] = jnp.zeros_like(o_ref)

    o_ref[...] += jnp.dot(a_ref[...], b_ref[...],
                          preferred_element_type=jnp.float32)


def _mm_bias_acc_out_kernel(a_ref, b_ref, bias_ref, o_ref):
    @pl.when(pl.program_id(2) == 0)
    def _():
        o_ref[...] = jnp.zeros_like(o_ref)

    o_ref[...] += jnp.dot(a_ref[...], b_ref[...],
                          preferred_element_type=jnp.float32)

    @pl.when(pl.program_id(2) == pl.num_programs(2) - 1)
    def _():
        # Bias added exactly once, in the finalize step. (An activation such
        # as ReLU could be fused here for free if the layer needs it.)
        o_ref[...] += bias_ref[...]


# Non-f32 output path: keep an f32 accumulator scratch.

def _mm_scratch_kernel(a_ref, b_ref, o_ref, acc_ref):
    @pl.when(pl.program_id(2) == 0)
    def _():
        acc_ref[...] = jnp.zeros_like(acc_ref)

    acc_ref[...] += jnp.dot(a_ref[...], b_ref[...],
                            preferred_element_type=jnp.float32)

    @pl.when(pl.program_id(2) == pl.num_programs(2) - 1)
    def _():
        o_ref[...] = acc_ref[...].astype(o_ref.dtype)


def _mm_bias_scratch_kernel(a_ref, b_ref, bias_ref, o_ref, acc_ref):
    @pl.when(pl.program_id(2) == 0)
    def _():
        acc_ref[...] = jnp.zeros_like(acc_ref)

    acc_ref[...] += jnp.dot(a_ref[...], b_ref[...],
                            preferred_element_type=jnp.float32)

    @pl.when(pl.program_id(2) == pl.num_programs(2) - 1)
    def _():
        o_ref[...] = (acc_ref[...] + bias_ref[...]).astype(o_ref.dtype)


# ------------------- single-K-pass (feature transform) ------------------- #

def _feature_kernel(a_ref, b_ref, o_ref):
    o_ref[...] = jnp.dot(a_ref[...], b_ref[...],
                         preferred_element_type=jnp.float32).astype(o_ref.dtype)


def _feature_bias_kernel(a_ref, b_ref, bias_ref, o_ref):
    o_ref[...] = (jnp.dot(a_ref[...], b_ref[...],
                          preferred_element_type=jnp.float32)
                  + bias_ref[...]).astype(o_ref.dtype)


# ------------------------- matmul wrappers ------------------------- #

def _matmul_tiled(a, b, bias=None, *, tile_m=512, tile_n=256, tile_k=1024,
                  mxu_dtype=None, out_dtype=jnp.float32):
    """out = a @ b (+ bias): (M, N, K)-tiled Pallas matmul, f32 accumulation."""
    M, K = a.shape
    K2, N = b.shape
    assert K == K2, (a.shape, b.shape)
    out_dtype = jnp.dtype(out_dtype)

    if mxu_dtype is not None:
        # No-op if the operand is already in mxu_dtype (pass adj pre-cast to
        # bf16 to avoid a full N^2 cast pass per forward).
        a = a.astype(mxu_dtype)
        b = b.astype(mxu_dtype)

    in_bytes = jnp.dtype(a.dtype).itemsize
    sub = 16 if in_bytes <= 2 else 8   # bf16 packs 16 sublanes per vreg

    tn = _choose_tile(N, tile_n, 128)
    tk = _choose_tile(K, tile_k, 128)
    tm = _choose_tile(M, tile_m, sub)
    Np = _round_up(N, tn)
    Kp = _round_up(K, tk)
    Mp = _round_up(M, tm)

    # Guarantee >= 2 blocks along a "parallel" axis so v7x's second
    # TensorCore has work even for small problems (e.g. 1x1 parallel grid).
    if (Mp // tm) * (Np // tn) == 1 and Mp >= 2 * sub:
        tm = _choose_tile(M, max(sub, tm // 2), sub)
        Mp = _round_up(M, tm)

    a_p = a if (Mp == M and Kp == K) else jnp.pad(a, ((0, Mp - M), (0, Kp - K)))
    b_p = b if (Kp == K and Np == N) else jnp.pad(b, ((0, Kp - K), (0, Np - N)))

    grid = (Mp // tm, Np // tn, Kp // tk)

    a_spec = pl.BlockSpec((tm, tk), lambda i, j, k: (i, k))
    b_spec = pl.BlockSpec((tk, tn), lambda i, j, k: (k, j))
    out_spec = pl.BlockSpec((tm, tn), lambda i, j, k: (i, j))
    out_shape = jax.ShapeDtypeStruct((Mp, Np), out_dtype)

    acc_in_out = out_dtype == jnp.float32
    scratch = [] if acc_in_out else [pltpu.VMEM((tm, tn), jnp.float32)]

    need = (2 * (tm * tk + tk * tn) * in_bytes        # double-buffered A, B
            + 2 * tm * tn * out_dtype.itemsize        # double-buffered output
            + (0 if acc_in_out else tm * tn * 4)      # accumulator scratch
            + 2 * tn * 4)                             # bias
    cparams = pltpu.CompilerParams(
        dimension_semantics=("parallel", "parallel", "arbitrary"),
        vmem_limit_bytes=_vmem_limit_bytes(need),
    )

    if bias is not None:
        bias_p = bias.reshape(1, -1).astype(jnp.float32)
        if Np != N:
            bias_p = jnp.pad(bias_p, ((0, 0), (0, Np - N)))
        in_specs = [a_spec, b_spec, pl.BlockSpec((1, tn), lambda i, j, k: (0, j))]
        kernel = _mm_bias_acc_out_kernel if acc_in_out else _mm_bias_scratch_kernel
        operands = (a_p, b_p, bias_p)
    else:
        in_specs = [a_spec, b_spec]
        kernel = _mm_acc_out_kernel if acc_in_out else _mm_scratch_kernel
        operands = (a_p, b_p)

    out_p = pl.pallas_call(
        kernel,
        out_shape=out_shape,
        grid_spec=pltpu.PrefetchScalarGridSpec(
            num_scalar_prefetch=0,
            grid=grid,
            in_specs=in_specs,
            out_specs=out_spec,
            scratch_shapes=scratch,
        ),
        compiler_params=cparams,
    )(*operands)

    if Mp != M or Np != N:
        out_p = out_p[:M, :N]
    return out_p


def _matmul_feature(a, b, bias=None, *, tile_m=512, out_dtype=jnp.float32):
    """out = a @ b (+ bias) with the full K dim done in a single MXU pass.

    Specialized for the small feature-transform GEMM: K (= F_in or F_out) is
    kept whole (block dim == array dim, so no rounding K up to 128 and no
    wasted DMA/MXU passes), the weight stays resident, there is no k grid
    axis, no accumulator scratch, and the bias is fused into the store.
    """
    M, K = a.shape
    K2, N = b.shape
    assert K == K2, (a.shape, b.shape)
    out_dtype = jnp.dtype(out_dtype)

    a = a.astype(jnp.float32)
    b = b.astype(jnp.float32)

    Np = _round_up(N, 128)
    tm = _choose_tile(M, tile_m, 8)
    Mp = _round_up(M, tm)
    if Mp // tm == 1 and Mp >= 16:          # keep both TensorCores busy (v7x)
        tm = _choose_tile(M, max(8, tm // 2), 8)
        Mp = _round_up(M, tm)

    need = 4 * (2 * tm * K + 2 * K * Np + 2 * tm * Np + 2 * Np)
    if need > (24 << 20):
        # Feature dims too large to keep resident in one pass: use tiled path.
        return _matmul_tiled(a, b, bias, tile_m=tile_m, out_dtype=out_dtype)

    a_p = a if Mp == M else jnp.pad(a, ((0, Mp - M), (0, 0)))
    b_p = b if Np == N else jnp.pad(b, ((0, 0), (0, Np - N)))

    grid = (Mp // tm,)
    a_spec = pl.BlockSpec((tm, K), lambda i: (i, 0))
    b_spec = pl.BlockSpec((K, Np), lambda i: (0, 0))      # whole weight resident
    out_spec = pl.BlockSpec((tm, Np), lambda i: (i, 0))
    out_shape = jax.ShapeDtypeStruct((Mp, Np), out_dtype)
    cparams = pltpu.CompilerParams(
        dimension_semantics=("parallel",),
        vmem_limit_bytes=_vmem_limit_bytes(need),
    )

    if bias is not None:
        bias_p = bias.reshape(1, -1).astype(jnp.float32)
        if Np != N:
            bias_p = jnp.pad(bias_p, ((0, 0), (0, Np - N)))
        out_p = pl.pallas_call(
            _feature_bias_kernel,
            out_shape=out_shape,
            grid_spec=pltpu.PrefetchScalarGridSpec(
                num_scalar_prefetch=0,
                grid=grid,
                in_specs=[a_spec, b_spec, pl.BlockSpec((1, Np), lambda i: (0, 0))],
                out_specs=out_spec,
            ),
            compiler_params=cparams,
        )(a_p, b_p, bias_p)
    else:
        out_p = pl.pallas_call(
            _feature_kernel,
            out_shape=out_shape,
            grid_spec=pltpu.PrefetchScalarGridSpec(
                num_scalar_prefetch=0,
                grid=grid,
                in_specs=[a_spec, b_spec],
                out_specs=out_spec,
            ),
            compiler_params=cparams,
        )(a_p, b_p)

    if Mp != M or Np != N:
        out_p = out_p[:M, :N]
    return out_p


# ------------------------- GCN forward ------------------------- #

@functools.partial(
    jax.jit, static_argnames=("mxu_dtype", "tile_m", "tile_n", "tile_k")
)
def graph_convolution(x, adj, weight, bias=None, *,
                      mxu_dtype=jnp.bfloat16,
                      tile_m=512, tile_n=256, tile_k=1024):
    """Pallas TPU implementation of GraphConvolution.forward.

    Computes adj @ (x @ W) (+ bias), reassociated as (adj @ x) @ W when
    F_in <= F_out so the dominant N x N GEMM carries the narrower feature dim.
    `mxu_dtype` is the dtype fed to the MXU for the adjacency GEMM
    (accumulation is always f32); pass adj pre-cast to that dtype to avoid a
    per-forward N^2 cast pass, or mxu_dtype=None for an all-f32 MXU path.
    """
    n, f_in = x.shape
    f_out = weight.shape[1]
    assert adj.shape == (n, n), (adj.shape, x.shape)
    assert weight.shape == (f_in, f_out)
    out_dtype = x.dtype

    if f_in <= f_out:
        # (adj @ x) @ W : the N^2 GEMM runs with the narrower width (F_in).
        tmp = _matmul_tiled(adj, x, tile_m=tile_m, tile_n=tile_n, tile_k=tile_k,
                            mxu_dtype=mxu_dtype, out_dtype=jnp.float32)
        out = _matmul_feature(tmp, weight, bias, tile_m=tile_m,
                              out_dtype=out_dtype)
    else:
        # adj @ (x @ W) : support has the narrower width (F_out).
        support = _matmul_feature(x, weight, None, tile_m=tile_m,
                                  out_dtype=jnp.float32)
        out = _matmul_tiled(adj, support, bias, tile_m=tile_m, tile_n=tile_n,
                            tile_k=tile_k, mxu_dtype=mxu_dtype,
                            out_dtype=out_dtype)
    return out


def init_params(key, in_features, out_features, use_bias):
    """Deterministic uniform(-stdv, stdv) init, matching reset_parameters()."""
    stdv = 1.0 / math.sqrt(out_features)
    kw, kb = jax.random.split(key)
    weight = jax.random.uniform(
        kw, (in_features, out_features), jnp.float32, minval=-stdv, maxval=stdv
    )
    bias = None
    if use_bias:
        bias = jax.random.uniform(
            kb, (out_features,), jnp.float32, minval=-stdv, maxval=stdv
        )
    return weight, bias


if __name__ == "__main__":
    key = jax.random.PRNGKey(0)
    k_x, k_adj, k_p = jax.random.split(key, 3)

    N = 256
    ok = True
    # Two feature configs exercise both matmul orderings (and both bias paths).
    for f_in, f_out in ((32, 64), (64, 32)):
        x = jax.random.normal(jax.random.fold_in(k_x, f_in), (N, f_in), jnp.float32)
        raw = jax.random.uniform(k_adj, (N, N), jnp.float32)
        adj = (raw + raw.T) / (2.0 * N)          # symmetric, roughly normalized
        adj_bf16 = adj.astype(jnp.bfloat16)      # cast once, outside the forward

        for use_bias in (False, True):
            weight, bias = init_params(jax.random.fold_in(k_p, f_out),
                                       f_in, f_out, use_bias)

            ref = jnp.dot(
                adj,
                jnp.dot(x, weight, precision=jax.lax.Precision.HIGHEST),
                precision=jax.lax.Precision.HIGHEST,
            )
            if bias is not None:
                ref = ref + bias

            # Exact f32-MXU path.
            out = jax.block_until_ready(
                graph_convolution(x, adj, weight, bias, mxu_dtype=None))
            ok &= bool(jnp.allclose(out, ref, atol=1e-4, rtol=1e-4))

            # Default path: bf16 MXU inputs for the adjacency GEMM with f32
            # accumulation -> looser tolerance for the bf16 input rounding.
            out_bf = jax.block_until_ready(
                graph_convolution(x, adj_bf16, weight, bias))
            ok &= bool(jnp.allclose(out_bf, ref, atol=5e-3, rtol=5e-2))

    print("KERNEL_OK" if ok else "MISMATCH")
</pallas_src>

<mosaic_0001>
module attributes {stable_mosaic.version = 11 : i64} {
  func.func @_mm_acc_out_kernel(%arg0: i32, %arg1: i32, %arg2: i32, %arg3: memref<128x256xf32, #tpu.memory_space<vmem>>, %arg4: memref<256x128xf32, #tpu.memory_space<vmem>>, %arg5: memref<128x128xf32, #tpu.memory_space<vmem>>) attributes {dimension_semantics = [#tpu.dimension_semantics<parallel>, #tpu.dimension_semantics<parallel>, #tpu.dimension_semantics<arbitrary>], iteration_bounds = array<i64: 2, 1, 1>, scalar_prefetch = 0 : i64, scratch_operands = 0 : i64, tpu.core_type = #tpu.core_type<tc>, window_params = [{transform_indices = @transform_0, window_bounds = array<i64: 128, 256>}, {transform_indices = @transform_1, window_bounds = array<i64: 256, 128>}, {transform_indices = @transform_2, window_bounds = array<i64: 128, 128>}]} {
    %c0_i32 = arith.constant 0 : i32
    %0 = arith.cmpi eq, %arg2, %c0_i32 : i32
    %1 = arith.extui %0 : i1 to i32
    %c0_i32_0 = arith.constant 0 : i32
    %2 = arith.cmpi ne, %1, %c0_i32_0 : i32
    scf.if %2 {
      %cst_8 = arith.constant 0.000000e+00 : f32
      %9 = vector.broadcast %cst_8 : f32 to vector<128x128xf32>
      %c0_9 = arith.constant 0 : index
      %c0_10 = arith.constant 0 : index
      %10 = vector.load %arg5[%c0_9, %c0_10] : memref<128x128xf32, #tpu.memory_space<vmem>>, vector<128x128xf32>
      tpu.vector_store %arg5[%c0_9, %c0_10], %9 {strides = array<i32>} : memref<128x128xf32, #tpu.memory_space<vmem>>, vector<128x128xf32>,
    } else {
    }
    %c0 = arith.constant 0 : index
    %c0_1 = arith.constant 0 : index
    %3 = vector.load %arg5[%c0, %c0_1] : memref<128x128xf32, #tpu.memory_space<vmem>>, vector<128x128xf32>
    %c0_2 = arith.constant 0 : index
    %c0_3 = arith.constant 0 : index
    %4 = vector.load %arg3[%c0_2, %c0_3] : memref<128x256xf32, #tpu.memory_space<vmem>>, vector<128x256xf32>
    %c0_4 = arith.constant 0 : index
    %c0_5 = arith.constant 0 : index
    %5 = vector.load %arg4[%c0_4, %c0_5] : memref<256x128xf32, #tpu.memory_space<vmem>>, vector<256x128xf32>
    %cst = arith.constant dense<0.000000e+00> : vector<128x128xf32>
    %6 = tpu.matmul %4, %5, %cst {dimension_numbers = #tpu.dot_dimension_numbers<[1], [0], [0], [1], [0, 0, 1, 1], [], []>} : vector<128x256xf32>, vector<256x128xf32>, vector<128x128xf32> -> vector<128x128xf32>
    %7 = arith.addf %3, %6 : vector<128x128xf32>
    %c0_6 = arith.constant 0 : index
    %c0_7 = arith.constant 0 : index
    %8 = vector.load %arg5[%c0_6, %c0_7] : memref<128x128xf32, #tpu.memory_space<vmem>>, vector<128x128xf32>
    tpu.vector_store %arg5[%c0_6, %c0_7], %7 {strides = array<i32>} : memref<128x128xf32, #tpu.memory_space<vmem>>, vector<128x128xf32>,
    return
  }
  func.func @transform_0(%arg0: i32, %arg1: i32, %arg2: i32) -> (i32, i32) {
    %c0_i32 = arith.constant 0 : i32
    return %arg0, %arg2 : i32, i32
  }
  func.func @transform_1(%arg0: i32, %arg1: i32, %arg2: i32) -> (i32, i32) {
    %c0_i32 = arith.constant 0 : i32
    return %arg2, %arg1 : i32, i32
  }
  func.func @transform_2(%arg0: i32, %arg1: i32, %arg2: i32) -> (i32, i32) {
    %c0_i32 = arith.constant 0 : i32
    return %arg0, %arg1 : i32, i32
  }
}

module attributes {stable_mosaic.version = 11 : i64} {
  func.func @_feature_kernel(%arg0: i32, %arg1: memref<128x32xf32, #tpu.memory_space<vmem>>, %arg2: memref<32x128xf32, #tpu.memory_space<vmem>>, %arg3: memref<128x128xf32, #tpu.memory_space<vmem>>) attributes {dimension_semantics = [#tpu.dimension_semantics<parallel>], iteration_bounds = array<i64: 2>, scalar_prefetch = 0 : i64, scratch_operands = 0 : i64, tpu.core_type = #tpu.core_type<tc>, window_params = [{transform_indices = @transform_0, window_bounds = array<i64: 128, 32>}, {pipeline_mode = #tpu.pipeline_mode<synchronous>, transform_indices = @transform_1, window_bounds = array<i64: 32, 128>}, {transform_indices = @transform_2, window_bounds = array<i64: 128, 128>}]} {
    %c0 = arith.constant 0 : index
    %c0_0 = arith.constant 0 : index
    %0 = vector.load %arg1[%c0, %c0_0] : memref<128x32xf32, #tpu.memory_space<vmem>>, vector<128x32xf32>
    %c0_1 = arith.constant 0 : index
    %c0_2 = arith.constant 0 : index
    %1 = vector.load %arg2[%c0_1, %c0_2] : memref<32x128xf32, #tpu.memory_space<vmem>>, vector<32x128xf32>
    %cst = arith.constant dense<0.000000e+00> : vector<128x128xf32>
    %2 = tpu.matmul %0, %1, %cst {dimension_numbers = #tpu.dot_dimension_numbers<[1], [0], [0], [1], [0, 0, 1, 1], [], []>} : vector<128x32xf32>, vector<32x128xf32>, vector<128x128xf32> -> vector<128x128xf32>
    %c0_3 = arith.constant 0 : index
    %c0_4 = arith.constant 0 : index
    %3 = vector.load %arg3[%c0_3, %c0_4] : memref<128x128xf32, #tpu.memory_space<vmem>>, vector<128x128xf32>
    tpu.vector_store %arg3[%c0_3, %c0_4], %2 {strides = array<i32>} : memref<128x128xf32, #tpu.memory_space<vmem>>, vector<128x128xf32>,
    return
  }
  func.func @transform_0(%arg0: i32) -> (i32, i32) {
    %c0_i32 = arith.constant 0 : i32
    %c0_i32_0 = arith.constant 0 : i32
    return %arg0, %c0_i32 : i32, i32
  }
  func.func @transform_1(%arg0: i32) -> (i32, i32) {
    %c0_i32 = arith.constant 0 : i32
    %c0_i32_0 = arith.constant 0 : i32
    %c0_i32_1 = arith.constant 0 : i32
    return %c0_i32, %c0_i32_0 : i32, i32
  }
  func.func @transform_2(%arg0: i32) -> (i32, i32) {
    %c0_i32 = arith.constant 0 : i32
    %c0_i32_0 = arith.constant 0 : i32
    return %arg0, %c0_i32 : i32, i32
  }
}

</mosaic_0001>

<bundles_post_ra>
// kernel: graph_convolution.2
= control target key start
LH: loop header
LB: loop body
LE: loop exit
PB: predicated region body
PF: predicated region fallthrough
CT: control target
= control target key end

     0   :  { %s811_s9 = smov 0   ;;  %s813_s10 = smov 0   ;;  %s996_s0 = inlined_call_operand.vmem [shape: f32[256,256], index: 0, kind: input, shape index: {}]   ;;  %s997_s1 = inlined_call_operand.vmem [shape: f32[256,128], index: 1, kind: input, shape index: {}]   ;;  %s998_s2 = inlined_call_operand.vmem [shape: f32[256,128], index: 2, kind: output, shape index: {}]  }
   0x1   :  { %s815_s11 = smov 0  }
   0x2 LB: > { %s31_s12 = sadd.s32 1, %s790_s10  ;;  %p610_p0 = scmp.ge.s32.totalorder %s794_s11, 1  ;;  %s794_s11 = sphi %s815_s11, %s12_s11   ;;  %s790_s10 = sphi %s813_s10, %s1000_s10   ;;  %s786_s9 = sphi %s811_s9, %s999_s9  }
   0x3   : > { %p33_p1 = scmp.ge.s32.totalorder %s31_s12, 2  ;;  %p158_p2 = scmp.lt.s32.totalorder %s794_s11, 3 }
   0x5   : > { %s1002_s12 = smov (%p33_p1, %s31_s12), 0  ;;  %p159_p3 = pnand %p610_p0, %p158_p2 }
   0x6   : > { %v310_v0 = vld [vmem:[%s997_s1 + $0x80] sm:$0xff] (!%p159_p3)  ;;  %v311_v1 = vld [vmem:[%s997_s1 + $0x88] sm:$0xff] (!%p159_p3)  ;;  %s611_s19 = sshll.u32 (!%p159_p3), %s786_s9, 4  ;;  %v312_v5 = vld [vmem:[%s997_s1 + $0x90] sm:$0xff] (!%p159_p3) }
   0x7   : > { %162 = sbr.rel (%p159_p3) target bundleno = 286 (0x11e), region = 28  ;;  %v294_v2 = vld [vmem:[%s997_s1] sm:$0xff] (!%p159_p3)  ;;  %v699_v3 = vpack.c.bf16 (!%p159_p3), %v311_v1, %v310_v0  ;;  %v295_v4 = vld [vmem:[%s997_s1 + $0x8] sm:$0xff] (!%p159_p3)  ;;  %v313_v6 = vld [vmem:[%s997_s1 + $0x98] sm:$0xff] (!%p159_p3)  ;;  %p198_p4 = scmp.lt.s32.totalorder (!%p159_p3), %s611_s19, 31 }
   0x8   : > { %v701_v7 = vpack.c.bf16 (!%p159_p3), %v295_v4, %v294_v2  ;;  %v703_v8 = vpack.c.bf16 (!%p159_p3), %v313_v6, %v312_v5  ;;  %v296_v9 = vld [vmem:[%s997_s1 + $0x10] sm:$0xff] (!%p159_p3)  ;;  %v297_v10 = vld [vmem:[%s997_s1 + $0x18] sm:$0xff] (!%p159_p3)  ;;  %v314_v11 = vld [vmem:[%s997_s1 + $0xa0] sm:$0xff] (!%p159_p3) }
   0x9   : > { %700 = vmatprep.subr.bf16.mxu0 (!%p159_p3), %v699_v3  ;;  %731 = vmatprep.subr.bf16.mxu1 (!%p159_p3), %v699_v3  ;;  %v315_v12 = vld [vmem:[%s997_s1 + $0xa8] sm:$0xff] (!%p159_p3)  ;;  %v705_v13 = vpack.c.bf16 (!%p159_p3), %v297_v10, %v296_v9  ;;  %v298_v15 = vld [vmem:[%s997_s1 + $0x20] sm:$0xff] (!%p159_p3)  ;;  %v316_v17 = vld [vmem:[%s997_s1 + $0xb0] sm:$0xff] (!%p159_p3) }
   0xa   : > { %702 = vmatpush3.bf16.msra.mxu0 (!%p159_p3), %v701_v7  ;;  %739 = vmatpush3.bf16.msra.mxu1 (!%p159_p3), %v701_v7  ;;  %v707_v14 = vpack.c.bf16 (!%p159_p3), %v315_v12, %v314_v11  ;;  %v299_v16 = vld [vmem:[%s997_s1 + $0x28] sm:$0xff] (!%p159_p3)  ;;  %v317_v18 = vld [vmem:[%s997_s1 + $0xb8] sm:$0xff] (!%p159_p3)  ;;  %v300_v21 = vld [vmem:[%s997_s1 + $0x30] sm:$0xff] (!%p159_p3) }
   0xb   : > { %704 = vmatprep.subr.bf16.mxu0 (!%p159_p3), %v703_v8  ;;  %732 = vmatprep.subr.bf16.mxu1 (!%p159_p3), %v703_v8  ;;  %v709_v19 = vpack.c.bf16 (!%p159_p3), %v299_v16, %v298_v15  ;;  %v711_v20 = vpack.c.bf16 (!%p159_p3), %v317_v18, %v316_v17  ;;  %v301_v22 = vld [vmem:[%s997_s1 + $0x38] sm:$0xff] (!%p159_p3)  ;;  %v318_v23 = vld [vmem:[%s997_s1 + $0xc0] sm:$0xff] (!%p159_p3)  ;;  %v319_v24 = vld [vmem:[%s997_s1 + $0xc8] sm:$0xff] (!%p159_p3) }
   0xc   : > { %v713_v27 = vpack.c.bf16 (!%p159_p3), %v301_v22, %v300_v21  ;;  %v715_v28 = vpack.c.bf16 (!%p159_p3), %v319_v24, %v318_v23  ;;  %v302_v29 = vld [vmem:[%s997_s1 + $0x40] sm:$0xff] (!%p159_p3)  ;;  %v303_v30 = vld [vmem:[%s997_s1 + $0x48] sm:$0xff] (!%p159_p3)  ;;  %v320_v31 = vld [vmem:[%s997_s1 + $0xd0] sm:$0xff] (!%p159_p3) }
   0xd   : > { %v321_v32 = vld [vmem:[%s997_s1 + $0xd8] sm:$0xff] (!%p159_p3)  ;;  %v717_v33 = vpack.c.bf16 (!%p159_p3), %v303_v30, %v302_v29  ;;  %v304_v35 = vld [vmem:[%s997_s1 + $0x50] sm:$0xff] (!%p159_p3)  ;;  %v322_v37 = vld [vmem:[%s997_s1 + $0xe0] sm:$0xff] (!%p159_p3) }
   0xe   : > { %s1004_s19 = smov (!%p198_p4, %s611_s19), 31  ;;  %706 = vmatpush3.bf16.msra.mxu0 %v705_v13  ;;  %740 = vmatpush3.bf16.msra.mxu1 %v705_v13  ;;  %v719_v34 = vpack.c.bf16 %v321_v32, %v320_v31  ;;  %v305_v36 = vld [vmem:[%s997_s1 + $0x58] sm:$0xff]  ;;  %v323_v38 = vld [vmem:[%s997_s1 + $0xe8] sm:$0xff]  ;;  %v306_v41 = vld [vmem:[%s997_s1 + $0x60] sm:$0xff] }
   0xf   : > { %s618_s13 = sshll.u32 %s1004_s19, 4  ;;  %708 = vmatprep.subr.bf16.mxu0 %v707_v14  ;;  %733 = vmatprep.subr.bf16.mxu1 %v707_v14  ;;  %v721_v39 = vpack.c.bf16 %v305_v36, %v304_v35  ;;  %v723_v40 = vpack.c.bf16 %v323_v38, %v322_v37  ;;  %v307_v42 = vld [vmem:[%s997_s1 + $0x68] sm:$0xff]  ;;  %v324_v43 = vld [vmem:[%s997_s1 + $0xf0] sm:$0xff]  ;;  %v325_v44 = vld [vmem:[%s997_s1 + $0xf8] sm:$0xff]  ;;  %s615_s7 = sshll.u32 %s1004_s19, 3 }
  0x10   : > { %s877_s21 = scalar_lea.vmem %s996_s0, %s618_s13  ;;  %v725_v45 = vpack.c.bf16 %v307_v42, %v306_v41  ;;  %v727_v46 = vpack.c.bf16 %v325_v44, %v324_v43  ;;  %v308_v47 = vld [vmem:[%s997_s1 + $0x70] sm:$0xff]  ;;  %v309_v48 = vld [vmem:[%s997_s1 + $0x78] sm:$0xff]  ;;  %s969_s13 = scalar_lea.vmem %s998_s2, %s615_s7 }
  0x11   : > { %v263_v25 = vld [vmem:[%s877_s21 + $0x8] sm:$0xff]  ;;  %v729_v49 = vpack.c.bf16 %v309_v48, %v308_v47  ;;  %v262_v50 = vld [vmem:[%s877_s21] sm:$0xff]  ;;  %v265_v52 = vld [vmem:[%s877_s21 + $0x18] sm:$0xff] }
  0x12   : > { %390 = vmatprep.mubr.f32.mxu0 %v263_v25  ;;  %v279_v26 = vld [vmem:[%s877_s21 + $0x88] sm:$0xff]  ;;  %710 = vmatpush3.bf16.msra.mxu0 %v709_v19  ;;  %v278_v51 = vld [vmem:[%s877_s21 + $0x80] sm:$0xff]  ;;  %v281_v53 = vld [vmem:[%s877_s21 + $0x98] sm:$0xff] }
  0x13   : > { %741 = vmatpush3.bf16.msra.mxu1 %v709_v19  ;;  %712 = vmatprep.subr.bf16.mxu0 %v711_v20  ;;  %v264_v54 = vld [vmem:[%s877_s21 + $0x10] sm:$0xff]  ;;  %v267_v56 = vld [vmem:[%s877_s21 + $0x28] sm:$0xff]  ;;  %v266_v58 = vld [vmem:[%s877_s21 + $0x20] sm:$0xff] }
  0x14   : > { %734 = vmatprep.subr.bf16.mxu1 %v711_v20  ;;  %430 = vmatprep.mubr.f32.mxu1 %v279_v26  ;;  %v280_v55 = vld [vmem:[%s877_s21 + $0x90] sm:$0xff]  ;;  %v283_v57 = vld [vmem:[%s877_s21 + $0xa8] sm:$0xff]  ;;  %v282_v59 = vld [vmem:[%s877_s21 + $0xa0] sm:$0xff] }
  0x15   : > { %v269_v60 = vld [vmem:[%s877_s21 + $0x38] sm:$0xff]  ;;  %v268_v62 = vld [vmem:[%s877_s21 + $0x30] sm:$0xff]  ;;  %v271_v0 = vld [vmem:[%s877_s21 + $0x48] sm:$0xff] }
  0x16   : > { %714 = vmatpush3.bf16.msra.mxu0 %v713_v27  ;;  %v285_v61 = vld [vmem:[%s877_s21 + $0xb8] sm:$0xff]  ;;  %v284_v63 = vld [vmem:[%s877_s21 + $0xb0] sm:$0xff]  ;;  %v287_v1 = vld [vmem:[%s877_s21 + $0xc8] sm:$0xff] }
  0x17   : > { %742 = vmatpush3.bf16.msra.mxu1 %v713_v27  ;;  %716 = vmatprep.subr.bf16.mxu0 %v715_v28  ;;  %v270_v2 = vld [vmem:[%s877_s21 + $0x40] sm:$0xff]  ;;  %v273_v4 = vld [vmem:[%s877_s21 + $0x58] sm:$0xff]  ;;  %v272_v6 = vld [vmem:[%s877_s21 + $0x50] sm:$0xff] }
  0x18   : > { %735 = vmatprep.subr.bf16.mxu1 %v715_v28  ;;  %v286_v3 = vld [vmem:[%s877_s21 + $0xc0] sm:$0xff]  ;;  %v289_v5 = vld [vmem:[%s877_s21 + $0xd8] sm:$0xff]  ;;  %v288_v7 = vld [vmem:[%s877_s21 + $0xd0] sm:$0xff] }
  0x19   : > { %v275_v8 = vld [vmem:[%s877_s21 + $0x68] sm:$0xff]  ;;  %v274_v10 = vld [vmem:[%s877_s21 + $0x60] sm:$0xff]  ;;  %v277_v12 = vld [vmem:[%s877_s21 + $0x78] sm:$0xff] }
  0x1a   : > { %718 = vmatpush3.bf16.msra.mxu0 %v717_v33  ;;  %v291_v9 = vld [vmem:[%s877_s21 + $0xe8] sm:$0xff]  ;;  %v290_v11 = vld [vmem:[%s877_s21 + $0xe0] sm:$0xff]  ;;  %v293_v13 = vld [vmem:[%s877_s21 + $0xf8] sm:$0xff] }
  0x1b   : > { %743 = vmatpush3.bf16.msra.mxu1 %v717_v33  ;;  %720 = vmatprep.subr.bf16.mxu0 %v719_v34  ;;  %v276_v14 = vld [vmem:[%s877_s21 + $0x70] sm:$0xff] }
  0x1c   : > { %736 = vmatprep.subr.bf16.mxu1 %v719_v34  ;;  %v292_v15 = vld [vmem:[%s877_s21 + $0xf0] sm:$0xff] }
  0x1e   : > { %722 = vmatpush3.bf16.msra.mxu0 %v721_v39 }
  0x1f   : > { %744 = vmatpush3.bf16.msra.mxu1 %v721_v39  ;;  %724 = vmatprep.subr.bf16.mxu0 %v723_v40 }
  0x20   : > { %737 = vmatprep.subr.bf16.mxu1 %v723_v40 }
  0x22   : > { %726 = vmatpush3.bf16.msra.mxu0 %v725_v45 }
  0x23   : > { %745 = vmatpush3.bf16.msra.mxu1 %v725_v45  ;;  %728 = vmatprep.subr.bf16.mxu0 %v727_v46 }
  0x24   : > { %738 = vmatprep.subr.bf16.mxu1 %v727_v46 }
  0x26   : > { %730 = vmatpush3.bf16.msra.mxu0 %v729_v49 }
  0x27   : > { %746 = vmatpush3.bf16.msra.mxu1 %v729_v49 }
  0x29   : > { %391 = vmatmul.mubr.f32.vlgmr.msra.gmra.mrb[0].mxu0 %v262_v50 }
  0x2a   : > { %431 = vmatmul.mubr.f32.vlgmr.msra.gmra.mrb[0].mxu1 %v278_v51  ;;  %395 = vmatprep.mubr.f32.mxu0 %v265_v52 }
  0x2b   : > { %435 = vmatprep.mubr.f32.mxu1 %v281_v53 }
  0x2d   : > { %396 = vmatmul.mubr.f32.gmra.mrb[2].mxu0 %v264_v54 }
  0x2e   : > { %436 = vmatmul.mubr.f32.gmra.mrb[2].mxu1 %v280_v55  ;;  %400 = vmatprep.mubr.f32.mxu0 %v267_v56 }
  0x2f   : > { %440 = vmatprep.mubr.f32.mxu1 %v283_v57 }
  0x31   : > { %401 = vmatmul.mubr.f32.gmra.mrb[4].mxu0 %v266_v58 }
  0x32   : > { %441 = vmatmul.mubr.f32.gmra.mrb[4].mxu1 %v282_v59  ;;  %405 = vmatprep.mubr.f32.mxu0 %v269_v60 }
  0x33   : > { %445 = vmatprep.mubr.f32.mxu1 %v285_v61 }
  0x35   : > { %406 = vmatmul.mubr.f32.gmra.mrb[6].mxu0 %v268_v62 }
  0x36   : > { %446 = vmatmul.mubr.f32.gmra.mrb[6].mxu1 %v284_v63  ;;  %410 = vmatprep.mubr.f32.mxu0 %v271_v0 }
  0x37   : > { %450 = vmatprep.mubr.f32.mxu1 %v287_v1 }
  0x39   : > { %411 = vmatmul.mubr.f32.gmra.mrb[8].mxu0 %v270_v2 }
  0x3a   : > { %451 = vmatmul.mubr.f32.gmra.mrb[8].mxu1 %v286_v3  ;;  %415 = vmatprep.mubr.f32.mxu0 %v273_v4 }
  0x3b   : > { %455 = vmatprep.mubr.f32.mxu1 %v289_v5 }
  0x3d   : > { %416 = vmatmul.mubr.f32.gmra.mrb[10].mxu0 %v272_v6 }
  0x3e   : > { %456 = vmatmul.mubr.f32.gmra.mrb[10].mxu1 %v288_v7  ;;  %420 = vmatprep.mubr.f32.mxu0 %v275_v8 }
  0x3f   : > { %460 = vmatprep.mubr.f32.mxu1 %v291_v9 }
  0x41   : > { %421 = vmatmul.mubr.f32.gmra.mrb[12].mxu0 %v274_v10 }
  0x42   : > { %461 = vmatmul.mubr.f32.gmra.mrb[12].mxu1 %v290_v11  ;;  %425 = vmatprep.mubr.f32.mxu0 %v277_v12 }
  0x43   : > { %465 = vmatprep.mubr.f32.mxu1 %v293_v13 }
  0x45   : > { %426 = vmatmul.mubr.f32.gmra.mrb[14].mxu0 %v276_v14 }
  0x46   : > { %466 = vmatmul.mubr.f32.gmra.mrb[14].mxu1 %v292_v15 }
  0xfc   : > { %v651_v16 = vpop.f32.mrb[0].mxu0 }
  0xfd   : > { %v675_v17 = vpop.f32.mrb[0].mxu1  ;;  %v652_v18 = vpop.f32.mrb[1].mxu0 }
  0xfe   : > { %v676_v19 = vpop.f32.mrb[1].mxu1  ;;  %v653_v20 = vadd.f32 %v652_v18, %v651_v16 }
  0xff   : > { %v677_v21 = vadd.f32 %v676_v19, %v675_v17 }
 0x100   : > { %v654_v22 = vpop.f32.mrb[2].mxu0  ;;  %487 = vst [vmem:[%s969_s13] sm:$0xff] %v653_v20 }
 0x101   : > { %v678_v23 = vpop.f32.mrb[2].mxu1  ;;  %v655_v24 = vpop.f32.mrb[3].mxu0  ;;  %495 = vst [vmem:[%s969_s13 + $0x40] sm:$0xff] %v677_v21 }
 0x102   : > { %v679_v25 = vpop.f32.mrb[3].mxu1  ;;  %v656_v26 = vadd.f32 %v655_v24, %v654_v22 }
 0x103   : > { %v680_v27 = vadd.f32 %v679_v25, %v678_v23 }
 0x104   : > { %v657_v28 = vpop.f32.mrb[4].mxu0  ;;  %488 = vst [vmem:[%s969_s13 + $0x8] sm:$0xff] %v656_v26 }
 0x105   : > { %v681_v29 = vpop.f32.mrb[4].mxu1  ;;  %v658_v30 = vpop.f32.mrb[5].mxu0  ;;  %496 = vst [vmem:[%s969_s13 + $0x48] sm:$0xff] %v680_v27 }
 0x106   : > { %v682_v31 = vpop.f32.mrb[5].mxu1  ;;  %v659_v32 = vadd.f32 %v658_v30, %v657_v28 }
 0x107   : > { %v683_v33 = vadd.f32 %v682_v31, %v681_v29 }
 0x108   : > { %v660_v34 = vpop.f32.mrb[6].mxu0  ;;  %489 = vst [vmem:[%s969_s13 + $0x10] sm:$0xff] %v659_v32 }
 0x109   : > { %v684_v35 = vpop.f32.mrb[6].mxu1  ;;  %v661_v36 = vpop.f32.mrb[7].mxu0  ;;  %497 = vst [vmem:[%s969_s13 + $0x50] sm:$0xff] %v683_v33 }
 0x10a   : > { %v685_v37 = vpop.f32.mrb[7].mxu1  ;;  %v662_v38 = vadd.f32 %v661_v36, %v660_v34 }
 0x10b   : > { %v686_v39 = vadd.f32 %v685_v37, %v684_v35 }
 0x10c   : > { %v663_v40 = vpop.f32.mrb[8].mxu0  ;;  %490 = vst [vmem:[%s969_s13 + $0x18] sm:$0xff] %v662_v38 }
 0x10d   : > { %v687_v41 = vpop.f32.mrb[8].mxu1  ;;  %v664_v42 = vpop.f32.mrb[9].mxu0  ;;  %498 = vst [vmem:[%s969_s13 + $0x58] sm:$0xff] %v686_v39 }
 0x10e   : > { %v688_v43 = vpop.f32.mrb[9].mxu1  ;;  %v665_v44 = vadd.f32 %v664_v42, %v663_v40 }
 0x10f   : > { %v689_v45 = vadd.f32 %v688_v43, %v687_v41 }
 0x110   : > { %v666_v46 = vpop.f32.mrb[10].mxu0  ;;  %491 = vst [vmem:[%s969_s13 + $0x20] sm:$0xff] %v665_v44 }
 0x111   : > { %v690_v47 = vpop.f32.mrb[10].mxu1  ;;  %v667_v48 = vpop.f32.mrb[11].mxu0  ;;  %499 = vst [vmem:[%s969_s13 + $0x60] sm:$0xff] %v689_v45 }
 0x112   : > { %v691_v49 = vpop.f32.mrb[11].mxu1  ;;  %v668_v50 = vadd.f32 %v667_v48, %v666_v46 }
 0x113   : > { %v692_v51 = vadd.f32 %v691_v49, %v690_v47 }
 0x114   : > { %v669_v52 = vpop.f32.mrb[12].mxu0  ;;  %492 = vst [vmem:[%s969_s13 + $0x28] sm:$0xff] %v668_v50 }
 0x115   : > { %v693_v53 = vpop.f32.mrb[12].mxu1  ;;  %v670_v54 = vpop.f32.mrb[13].mxu0  ;;  %500 = vst [vmem:[%s969_s13 + $0x68] sm:$0xff] %v692_v51 }
 0x116   : > { %v694_v55 = vpop.f32.mrb[13].mxu1  ;;  %v671_v56 = vadd.f32 %v670_v54, %v669_v52 }
 0x117   : > { %v695_v57 = vadd.f32 %v694_v55, %v693_v53 }
 0x118   : > { %v672_v58 = vpop.f32.mrb[14].mxu0  ;;  %493 = vst [vmem:[%s969_s13 + $0x30] sm:$0xff] %v671_v56 }
 0x119   : > { %v696_v59 = vpop.f32.mrb[14].mxu1  ;;  %v673_v60 = vpop.f32.mrb[15].mxu0  ;;  %501 = vst [vmem:[%s969_s13 + $0x70] sm:$0xff] %v695_v57 }
 0x11a   : > { %v697_v61 = vpop.f32.mrb[15].mxu1  ;;  %v674_v62 = vadd.f32 %v673_v60, %v672_v58 }
 0x11b   : > { %v698_v63 = vadd.f32 %v697_v61, %v696_v59 }
 0x11c   : > { %494 = vst [vmem:[%s969_s13 + $0x38] sm:$0xff] %v674_v62 }
 0x11d   : > { %502 = vst [vmem:[%s969_s13 + $0x78] sm:$0xff] %v698_v63 }
 0x11e PF: > { %s12_s11 = sadd.s32 1, %s794_s11   ;;  %s999_s9 = smov %s790_s10 }
 0x11f   : > { %p9_p5 = scmp.ge.s32.totalorder %s12_s11, 4   ;;  %s1000_s10 = smov %s1002_s12 }
 0x121   :  { %11 = sbr.rel (!%p9_p5) target bundleno = 2 (0x2), region = 65 }

// kernel: graph_convolution.3
= control target key start
LH: loop header
LB: loop body
LE: loop exit
PB: predicated region body
PF: predicated region fallthrough
CT: control target
= control target key end

     0   :  { %s555_s9 = smov 0   ;;  %s643_s0 = inlined_call_operand.vmem [shape: f32[256,32], index: 0, kind: input, shape index: {}]   ;;  %s644_s1 = inlined_call_operand.vmem [shape: f32[32,128], index: 1, kind: input, shape index: {}]   ;;  %s645_s2 = inlined_call_operand.vmem [shape: f32[256,128], index: 2, kind: output, shape index: {}]  }
   0x1 LB: > { %s433_s10 = sadd.s32 4294967295, %s538_s9   ;;  %p437_p0 = scmp.ge.s32.totalorder %s538_s9, 1  ;;  %s538_s9 = sphi %s555_s9, %s12_s9  }
   0x2   : > { %p113_p1 = scmp.lt.s32.totalorder %s538_s9, 3 }
   0x4   : > { %p114_p2 = pnand %p437_p0, %p113_p1 }
   0x5   : > { %v163_v0 = vld [vmem:[%s644_s1] sm:$0xff] (!%p114_p2)  ;;  %v164_v1 = vld [vmem:[%s644_s1 + $0x8] sm:$0xff] (!%p114_p2)  ;;  %v165_v2 = vld [vmem:[%s644_s1 + $0x10] sm:$0xff] (!%p114_p2)  ;;  %s438_s17 = sshll.u32 (!%p114_p2), %s433_s10, 4  ;;  %vm167_vm0 = vcmask (!%p114_p2), 261120  }
   0x6   : > { %117 = sbr.rel (%p114_p2) target bundleno = 245 (0xf5), region = 28  ;;  %v512_v3 = vpack.c.bf16 (!%p114_p2), %v164_v1, %v163_v0  ;;  %v166_v4 = vld [vmem:[%s644_s1 + $0x18] sm:$0xff] (!%p114_p2)  ;;  %p136_p3 = scmp.lt.s32.totalorder (!%p114_p2), %s438_s17, 31 }
   0x7   : > { %v516_v5 = vpack.c.bf16 (!%p114_p2), %v166_v4, %v165_v2 }
   0x8   : > { %513 = vmatprep.subr.bf16.mxu0 (!%p114_p2), %v512_v3  ;;  %520 = vmatprep.subr.bf16.mxu1 (!%p114_p2), %v512_v3 }
   0x9   : > { %515 = vmatpush3.bf16.msra.mxu0 (!%p114_p2), %v512_v3  ;;  %522 = vmatpush3.bf16.msra.mxu1 (!%p114_p2), %v512_v3 }
   0xa   : > { %517 = vmatprep.subr.bf16.mxu0 (!%p114_p2), %v516_v5  ;;  %521 = vmatprep.subr.bf16.mxu1 (!%p114_p2), %v516_v5 }
   0xd   : > { %s647_s17 = smov (!%p136_p3, %s438_s17), 31  ;;  %519 = vmatpush3.bf16.msra.mxu0 %v516_v5  ;;  %523 = vmatpush3.bf16.msra.mxu1 %v516_v5 }
   0xe   : > { %s439_s20 = sshll.u32 %s647_s17, 3 }
   0xf   : > { %s583_s23 = scalar_lea.vmem %s643_s0, %s439_s20  ;;  %s622_s26 = scalar_lea.vmem %s645_s2, %s439_s20 }
  0x10   : > { %v147_v6 = vld [vmem:[%s583_s23] sm:$0xff]  ;;  %v148_v8 = vld [vmem:[%s583_s23 + $0x8] sm:$0xff]  ;;  %v149_v10 = vld [vmem:[%s583_s23 + $0x10] sm:$0xff] }
  0x11   : > { %v155_v7 = vld [vmem:[%s583_s23 + $0x40] sm:$0xff]  ;;  %v156_v9 = vld [vmem:[%s583_s23 + $0x48] sm:$0xff]  ;;  %488 = vmatprep.mubr.msk.f32.mxu0 %vm167_vm0, %v147_v6  ;;  %v157_v11 = vld [vmem:[%s583_s23 + $0x50] sm:$0xff] }
  0x12   : > { %500 = vmatprep.mubr.msk.f32.mxu1 %vm167_vm0, %v155_v7  ;;  %489 = vmatmul.mubr.msk.f32.vlgmr.msra.gmra.mrb[0].mxu0 %vm167_vm0, %v148_v8  ;;  %v150_v12 = vld [vmem:[%s583_s23 + $0x18] sm:$0xff]  ;;  %v151_v14 = vld [vmem:[%s583_s23 + $0x20] sm:$0xff]  ;;  %v152_v16 = vld [vmem:[%s583_s23 + $0x28] sm:$0xff] }
  0x13   : > { %501 = vmatmul.mubr.msk.f32.vlgmr.msra.gmra.mrb[0].mxu1 %vm167_vm0, %v156_v9  ;;  %491 = vmatprep.mubr.msk.f32.mxu0 %vm167_vm0, %v149_v10  ;;  %v158_v13 = vld [vmem:[%s583_s23 + $0x58] sm:$0xff]  ;;  %v159_v15 = vld [vmem:[%s583_s23 + $0x60] sm:$0xff]  ;;  %v160_v17 = vld [vmem:[%s583_s23 + $0x68] sm:$0xff] }
  0x14   : > { %503 = vmatprep.mubr.msk.f32.mxu1 %vm167_vm0, %v157_v11  ;;  %v153_v18 = vld [vmem:[%s583_s23 + $0x30] sm:$0xff]  ;;  %v154_v20 = vld [vmem:[%s583_s23 + $0x38] sm:$0xff] }
  0x15   : > { %v161_v19 = vld [vmem:[%s583_s23 + $0x70] sm:$0xff]  ;;  %v162_v21 = vld [vmem:[%s583_s23 + $0x78] sm:$0xff] }
  0x16   : > { %492 = vmatmul.mubr.msk.f32.gmra.mrb[2].mxu0 %vm167_vm0, %v150_v12 }
  0x17   : > { %504 = vmatmul.mubr.msk.f32.gmra.mrb[2].mxu1 %vm167_vm0, %v158_v13  ;;  %494 = vmatprep.mubr.msk.f32.mxu0 %vm167_vm0, %v151_v14 }
  0x18   : > { %506 = vmatprep.mubr.msk.f32.mxu1 %vm167_vm0, %v159_v15 }
  0x1a   : > { %495 = vmatmul.mubr.msk.f32.gmra.mrb[4].mxu0 %vm167_vm0, %v152_v16 }
  0x1b   : > { %507 = vmatmul.mubr.msk.f32.gmra.mrb[4].mxu1 %vm167_vm0, %v160_v17  ;;  %497 = vmatprep.mubr.msk.f32.mxu0 %vm167_vm0, %v153_v18 }
  0x1c   : > { %509 = vmatprep.mubr.msk.f32.mxu1 %vm167_vm0, %v161_v19 }
  0x1e   : > { %498 = vmatmul.mubr.msk.f32.gmra.mrb[6].mxu0 %vm167_vm0, %v154_v20 }
  0x1f   : > { %510 = vmatmul.mubr.msk.f32.gmra.mrb[6].mxu1 %vm167_vm0, %v162_v21 }
  0xe5   : > { %v490_v22 = vpop.f32.mrb[0].mxu0 }
  0xe6   : > { %v502_v23 = vpop.f32.mrb[0].mxu1  ;;  %362 = vst [vmem:[%s622_s26 + $0x8] sm:$0xff] %v490_v22  ;;  %v282_v24 = vpop.f32.mrb[1].mxu0 }
  0xe7   : > { %370 = vst [vmem:[%s622_s26 + $0x48] sm:$0xff] %v502_v23  ;;  %v322_v25 = vpop.f32.mrb[1].mxu1  ;;  %361 = vst [vmem:[%s622_s26] sm:$0xff] %v282_v24 }
  0xe8   : > { %369 = vst [vmem:[%s622_s26 + $0x40] sm:$0xff] %v322_v25 }
  0xe9   : > { %v493_v26 = vpop.f32.mrb[2].mxu0 }
  0xea   : > { %v505_v27 = vpop.f32.mrb[2].mxu1  ;;  %364 = vst [vmem:[%s622_s26 + $0x18] sm:$0xff] %v493_v26  ;;  %v292_v28 = vpop.f32.mrb[3].mxu0 }
  0xeb   : > { %372 = vst [vmem:[%s622_s26 + $0x58] sm:$0xff] %v505_v27  ;;  %v332_v29 = vpop.f32.mrb[3].mxu1  ;;  %363 = vst [vmem:[%s622_s26 + $0x10] sm:$0xff] %v292_v28 }
  0xec   : > { %371 = vst [vmem:[%s622_s26 + $0x50] sm:$0xff] %v332_v29 }
  0xed   : > { %v496_v30 = vpop.f32.mrb[4].mxu0 }
  0xee   : > { %v508_v31 = vpop.f32.mrb[4].mxu1  ;;  %366 = vst [vmem:[%s622_s26 + $0x28] sm:$0xff] %v496_v30  ;;  %v302_v32 = vpop.f32.mrb[5].mxu0 }
  0xef   : > { %374 = vst [vmem:[%s622_s26 + $0x68] sm:$0xff] %v508_v31  ;;  %v342_v33 = vpop.f32.mrb[5].mxu1  ;;  %365 = vst [vmem:[%s622_s26 + $0x20] sm:$0xff] %v302_v32 }
  0xf0   : > { %373 = vst [vmem:[%s622_s26 + $0x60] sm:$0xff] %v342_v33 }
  0xf1   : > { %v499_v34 = vpop.f32.mrb[6].mxu0 }
  0xf2   : > { %v511_v35 = vpop.f32.mrb[6].mxu1  ;;  %368 = vst [vmem:[%s622_s26 + $0x38] sm:$0xff] %v499_v34  ;;  %v312_v36 = vpop.f32.mrb[7].mxu0 }
  0xf3   : > { %376 = vst [vmem:[%s622_s26 + $0x78] sm:$0xff] %v511_v35  ;;  %v352_v37 = vpop.f32.mrb[7].mxu1  ;;  %367 = vst [vmem:[%s622_s26 + $0x30] sm:$0xff] %v312_v36 }
  0xf4   : > { %375 = vst [vmem:[%s622_s26 + $0x70] sm:$0xff] %v352_v37 }
  0xf5 PF: > { %s12_s9 = sadd.s32 1, %s538_s9  }
  0xf6   : > { %p9_p4 = scmp.ge.s32.totalorder %s12_s9, 4  }
  0xf8   :  { %11 = sbr.rel (!%p9_p4) target bundleno = 1 (0x1), region = 58 }

</bundles_post_ra>
